<compile_context>
chip_gen: v5e
topology: v5e:2x2
jax: 0.10.0
libtpu: 0.0.40
codegen_flags: <defaults>
</compile_context>

<pallas_src>
import functools

import jax
import jax.numpy as jnp
from jax.experimental import pallas as pl
from jax.experimental.pallas import tpu as pltpu


@functools.lru_cache(maxsize=None)
def _vmem_limit_bytes():
    """Generation-aware scoped-VMEM budget (v5e/v6e: 64 MiB, v7x: ~44 MiB)."""
    phys = 64 * 1024 * 1024            # conservative default (v7x physical size)
    try:
        info = pltpu.get_tpu_info()
        phys = int(getattr(info, "vmem_capacity_bytes", phys))
    except Exception:
        pass
    return min(int(phys * 0.7), 64 * 1024 * 1024)


def _sublane_align(dtype):
    return 16 if dtype == jnp.bfloat16 else 8


def _pick_tile(dim, target, align):
    """Largest `align`-aligned tile <= target that divides `dim`; falls back to
    the full dim (always a legal block) when dim is small or has no aligned
    divisor.  TODO(synk): pad-and-mask path for huge prime-ish dims."""
    if dim <= target:
        return dim
    t = (target // align) * align
    while t >= align:
        if dim % t == 0:
            return t
        t -= align
    return dim


# ----------------------------------------------------------------------------
# Tiled matmul kernels (optional f32 bias)
# ----------------------------------------------------------------------------
def _matmul_kernel(x_ref, w_ref, o_ref, acc_ref):
    @pl.when(pl.program_id(2) == 0)
    def _init():
        acc_ref[...] = jnp.zeros(acc_ref.shape, jnp.float32)

    acc_ref[...] += jnp.dot(x_ref[...], w_ref[...],
                            preferred_element_type=jnp.float32)

    @pl.when(pl.program_id(2) == pl.num_programs(2) - 1)
    def _store():
        o_ref[...] = acc_ref[...].astype(o_ref.dtype)


def _matmul_bias_kernel(x_ref, w_ref, b_ref, o_ref, acc_ref):
    @pl.when(pl.program_id(2) == 0)
    def _init():
        acc_ref[...] = jnp.zeros(acc_ref.shape, jnp.float32)

    acc_ref[...] += jnp.dot(x_ref[...], w_ref[...],
                            preferred_element_type=jnp.float32)

    @pl.when(pl.program_id(2) == pl.num_programs(2) - 1)
    def _store():
        # Bias is f32 end-to-end; add in f32, cast once on store.
        o_ref[...] = (acc_ref[...] + b_ref[...]).astype(o_ref.dtype)


def _linear(x2d, w, b=None, *, tm=512, tn=512, tk=1024):
    """y = x2d @ w (+ b).  Tiled, software-pipelined Pallas matmul, f32 acc."""
    M, K = x2d.shape
    K2, N = w.shape
    assert K == K2
    tm = _pick_tile(M, tm, _sublane_align(x2d.dtype))
    tn = _pick_tile(N, tn, 128)
    tk = _pick_tile(K, tk, 128)
    grid = (M // tm, N // tn, K // tk)

    in_specs = [
        pl.BlockSpec((tm, tk), lambda i, j, k: (i, k)),
        pl.BlockSpec((tk, tn), lambda i, j, k: (k, j)),
    ]
    operands = [x2d, w]
    kernel = _matmul_kernel
    if b is not None:
        in_specs.append(pl.BlockSpec((1, tn), lambda i, j, k: (0, j)))
        operands.append(b.reshape(1, N).astype(jnp.float32))   # bias stays f32
        kernel = _matmul_bias_kernel

    return pl.pallas_call(
        kernel,
        out_shape=jax.ShapeDtypeStruct((M, N), x2d.dtype),
        grid=grid,
        in_specs=in_specs,
        out_specs=pl.BlockSpec((tm, tn), lambda i, j, k: (i, j)),
        scratch_shapes=[pltpu.VMEM((tm, tn), jnp.float32)],
        compiler_params=pltpu.CompilerParams(
            dimension_semantics=("parallel", "parallel", "arbitrary"),
            vmem_limit_bytes=_vmem_limit_bytes()),
    )(*operands)


# ----------------------------------------------------------------------------
# Flash-style attention (online softmax, head-batched einsums)
# ----------------------------------------------------------------------------
def _flash_attn_kernel(q_ref, k_ref, v_ref, o_ref,
                       qs_ref, ks_ref, vs_ref, m_ref, l_ref, acc_ref,
                       *, scale, heads):
    # q_ref: (tq, h, d), k_ref/v_ref: (tk, h, d), o_ref: (tq, h, d)
    # qs_ref: (h, tq, d) compute dtype (scaled q), ks/vs: (h, tk, d)
    # m_ref/l_ref: (h, tq, 1) f32, acc_ref: (h, tq, d) f32
    ki = pl.program_id(2)

    @pl.when(ki == 0)
    def _init():
        q = q_ref[...]
        for hi in range(heads):                              # once per q tile
            qs_ref[hi] = (q[:, hi, :] * scale).astype(qs_ref.dtype)
        m_ref[...] = jnp.full(m_ref.shape, -jnp.inf, jnp.float32)
        l_ref[...] = jnp.zeros(l_ref.shape, jnp.float32)
        acc_ref[...] = jnp.zeros(acc_ref.shape, jnp.float32)

    # Stage K/V head-major (copies only; all math below is head-batched).
    k = k_ref[...]
    v = v_ref[...]
    for hi in range(heads):
        ks_ref[hi] = k[:, hi, :]
        vs_ref[hi] = v[:, hi, :]

    # s = (q * scale) @ k^T for all heads in one batched MXU call.
    s = jnp.einsum('hqd,hkd->hqk', qs_ref[...], ks_ref[...],
                   preferred_element_type=jnp.float32)       # (h, tq, tk)

    m_prev = m_ref[...]                                      # (h, tq, 1)
    m_new = jnp.maximum(m_prev, jnp.max(s, axis=-1, keepdims=True))
    alpha = jnp.exp(m_prev - m_new)
    p = jnp.exp(s - m_new)                                   # (h, tq, tk)
    l_ref[...] = alpha * l_ref[...] + jnp.sum(p, axis=-1, keepdims=True)
    acc_ref[...] = alpha * acc_ref[...] + jnp.einsum(
        'hqk,hkd->hqd', p.astype(vs_ref.dtype), vs_ref[...],
        preferred_element_type=jnp.float32)                  # (h, tq, d)
    m_ref[...] = m_new

    @pl.when(ki == pl.num_programs(2) - 1)
    def _finalize():
        inv_l = pl.reciprocal(l_ref[...], approx=False)      # (h, tq, 1), EUP
        o = (acc_ref[...] * inv_l).astype(o_ref.dtype)       # (h, tq, d)
        for hi in range(heads):                              # once per q tile
            o_ref[:, hi, :] = o[hi]
    # TODO(synk): optional `mask` (masked_fill before softmax) not implemented.


def _flash_attention(q_pack, q_idx, kv_pack, k_idx, v_idx, scale, *,
                     tq=512, tk=256):
    """q_pack: (B, N, Pq, h, d), kv_pack: (B, M, Pkv, h, d) -> (B, N, h, d).

    q/k/v are column-packs of fused projections; BlockSpec index_maps pick the
    right pack slice (no wrapper-side slicing or head split/merge transposes)."""
    B, N, _, h, d = q_pack.shape
    M = kv_pack.shape[1]
    tq = _pick_tile(N, tq, _sublane_align(q_pack.dtype))
    tk = _pick_tile(M, tk, 128)   # lane dim of s/p and contraction dim of P@V

    grid = (B, N // tq, M // tk)

    q_spec = pl.BlockSpec((None, tq, None, h, d),
                          lambda b, qi, ki: (b, qi, q_idx, 0, 0))
    k_spec = pl.BlockSpec((None, tk, None, h, d),
                          lambda b, qi, ki: (b, ki, k_idx, 0, 0))
    v_spec = pl.BlockSpec((None, tk, None, h, d),
                          lambda b, qi, ki: (b, ki, v_idx, 0, 0))
    o_spec = pl.BlockSpec((None, tq, h, d),
                          lambda b, qi, ki: (b, qi, 0, 0))

    return pl.pallas_call(
        functools.partial(_flash_attn_kernel, scale=scale, heads=h),
        out_shape=jax.ShapeDtypeStruct((B, N, h, d), q_pack.dtype),
        grid=grid,
        in_specs=[q_spec, k_spec, v_spec],
        out_specs=o_spec,
        scratch_shapes=[
            pltpu.VMEM((h, tq, d), q_pack.dtype),    # head-major scaled q
            pltpu.VMEM((h, tk, d), kv_pack.dtype),   # head-major k
            pltpu.VMEM((h, tk, d), kv_pack.dtype),   # head-major v
            pltpu.VMEM((h, tq, 1), jnp.float32),     # running max m (lane-padded)
            pltpu.VMEM((h, tq, 1), jnp.float32),     # running denom l
            pltpu.VMEM((h, tq, d), jnp.float32),     # running numerator
        ],
        compiler_params=pltpu.CompilerParams(
            dimension_semantics=("parallel", "parallel", "arbitrary"),
            vmem_limit_bytes=_vmem_limit_bytes()),
    )(q_pack, kv_pack, kv_pack)


# ----------------------------------------------------------------------------
# CrossAttention module (parameters + wrapper glue)
# ----------------------------------------------------------------------------
class CrossAttentionPallas:
    def __init__(self, query_dim, context_dim=None, heads=8, dim_head=64,
                 dropout=0.0, key=None, compute_dtype=jnp.bfloat16):
        inner_dim = dim_head * heads
        if context_dim is None:
            context_dim = query_dim
        self.scale = dim_head ** (-0.5)
        self.heads = heads
        self.dim_head = dim_head
        self.query_dim = query_dim
        self.context_dim = context_dim
        self.compute_dtype = compute_dtype

        key = jax.random.PRNGKey(0) if key is None else key
        kq, kk, kv, ko, kb = jax.random.split(key, 5)
        # PyTorch nn.Linear weights are (out_features, in_features); y = x W^T (+ b).
        # f32 master weights (used by the pure-JAX reference).
        self.Wq = jax.random.normal(kq, (inner_dim, query_dim), jnp.float32) * query_dim ** -0.5
        self.Wk = jax.random.normal(kk, (inner_dim, context_dim), jnp.float32) * context_dim ** -0.5
        self.Wv = jax.random.normal(kv, (inner_dim, context_dim), jnp.float32) * context_dim ** -0.5
        self.Wo = jax.random.normal(ko, (query_dim, inner_dim), jnp.float32) * inner_dim ** -0.5
        self.bo = jax.random.normal(kb, (query_dim,), jnp.float32) * 0.02

        # Pre-fused projection weights in (in, out) layout, pre-cast to the
        # compute dtype (bf16 by default -> bf16-rate MXU on v5e/v6e/v7x).
        cd = compute_dtype
        self.w_q = self.Wq.T.astype(cd)                                          # (C, inner)
        self.w_kv = jnp.concatenate([self.Wk.T, self.Wv.T], axis=1).astype(cd)   # (Cc, 2*inner)
        self.w_qkv = (jnp.concatenate([self.Wq.T, self.Wk.T, self.Wv.T], axis=1).astype(cd)
                      if context_dim == query_dim else None)                     # (C, 3*inner)
        self.w_o = self.Wo.T.astype(cd)                                          # (inner, C)
        # Output-projection bias stays f32 and is added in f32 inside the kernel.

    def __call__(self, x, context=None):
        B, N, C = x.shape
        h, d = self.heads, self.dim_head
        inner = h * d
        cd = self.compute_dtype
        xc = x.astype(cd)

        if context is None and self.w_qkv is not None:
            # Self-attention: one fused QKV projection (single pass over x, wide MXU N).
            qkv = _linear(xc.reshape(B * N, C), self.w_qkv)     # (B*N, 3*inner)
            q_pack = qkv.reshape(B, N, 3, h, d)                 # free reshape
            kv_pack = q_pack
            q_idx, k_idx, v_idx = 0, 1, 2
        else:
            ctx = (x if context is None else context).astype(cd)
            M, Cc = ctx.shape[1], ctx.shape[2]
            q = _linear(xc.reshape(B * N, C), self.w_q)
            kv = _linear(ctx.reshape(B * M, Cc), self.w_kv)     # fused K|V projection
            q_pack = q.reshape(B, N, 1, h, d)
            kv_pack = kv.reshape(B, M, 2, h, d)
            q_idx, k_idx, v_idx = 0, 0, 1

        o = _flash_attention(q_pack, q_idx, kv_pack, k_idx, v_idx, self.scale)
        # (B, N, h, d) -> (B*N, h*d) is a free, lane-dense reshape for the out proj.
        out = _linear(o.reshape(B * N, inner), self.w_o, self.bo)
        # Dropout(p=0.0) -> identity.
        return out.reshape(B, N, self.query_dim).astype(x.dtype)


# ----------------------------------------------------------------------------
# Pure-JAX reference for correctness checks
# ----------------------------------------------------------------------------
def _reference(mod, x, context=None):
    B, N, C = x.shape
    h, d = mod.heads, mod.dim_head
    ctx = x if context is None else context
    M = ctx.shape[1]
    q = x @ mod.Wq.T
    k = ctx @ mod.Wk.T
    v = ctx @ mod.Wv.T

    def split(t, L):
        return t.reshape(B, L, h, d).transpose(0, 2, 1, 3).reshape(B * h, L, d)

    q, k, v = split(q, N), split(k, M), split(v, M)
    sim = jnp.einsum('bid,bjd->bij', q, k) * mod.scale
    attn = jax.nn.softmax(sim, axis=-1)
    o = jnp.einsum('bij,bjd->bid', attn, v)
    o = o.reshape(B, h, N, d).transpose(0, 2, 1, 3).reshape(B, N, h * d)
    return o @ mod.Wo.T + mod.bo


if __name__ == "__main__":
    key = jax.random.PRNGKey(0)
    kx, kc, kp, kp2 = jax.random.split(key, 4)

    B, N, query_dim = 2, 8, 32
    heads, dim_head = 4, 8

    x = jax.random.normal(kx, (B, N, query_dim), jnp.float32)

    # --- self-attention, f32 compute path (tight check) ---------------------
    mod_f32 = CrossAttentionPallas(query_dim=query_dim, heads=heads,
                                   dim_head=dim_head, dropout=0.0, key=kp,
                                   compute_dtype=jnp.float32)
    out_f32 = jax.block_until_ready(mod_f32(x))          # context=None, mask=None
    ref = _reference(mod_f32, x)
    assert out_f32.shape == (B, N, query_dim)
    assert jnp.allclose(out_f32, ref, atol=1e-2, rtol=1e-2), "f32 mismatch vs reference"

    # --- self-attention, default bf16 compute path (looser tolerance) -------
    mod_bf16 = CrossAttentionPallas(query_dim=query_dim, heads=heads,
                                    dim_head=dim_head, dropout=0.0, key=kp)
    out_bf16 = jax.block_until_ready(mod_bf16(x))
    assert out_bf16.shape == (B, N, query_dim)
    assert jnp.allclose(out_bf16, ref, atol=1e-1, rtol=1e-1), "bf16 mismatch vs reference"

    # --- cross-attention path (context with different length / width) -------
    Mctx, context_dim = 16, 64
    context = jax.random.normal(kc, (B, Mctx, context_dim), jnp.float32)
    mod_x = CrossAttentionPallas(query_dim=query_dim, context_dim=context_dim,
                                 heads=heads, dim_head=dim_head, dropout=0.0,
                                 key=kp2)
    out_x = jax.block_until_ready(mod_x(x, context))
    ref_x = _reference(mod_x, x, context)
    assert out_x.shape == (B, N, query_dim)
    assert jnp.allclose(out_x, ref_x, atol=1e-1, rtol=1e-1), "cross-attn mismatch vs reference"

    print("KERNEL_OK")
</pallas_src>

<mosaic_0001>
module attributes {stable_mosaic.version = 11 : i64} {
  func.func @_matmul_kernel(%arg0: i32, %arg1: i32, %arg2: i32, %arg3: memref<16x32xf32, #tpu.memory_space<vmem>>, %arg4: memref<32x96xf32, #tpu.memory_space<vmem>>, %arg5: memref<16x96xf32, #tpu.memory_space<vmem>>, %arg6: memref<16x96xf32, #tpu.memory_space<vmem>>) attributes {dimension_semantics = [#tpu.dimension_semantics<parallel>, #tpu.dimension_semantics<parallel>, #tpu.dimension_semantics<arbitrary>], iteration_bounds = array<i64: 1, 1, 1>, scalar_prefetch = 0 : i64, scratch_operands = 1 : i64, tpu.core_type = #tpu.core_type<tc>, window_params = [{transform_indices = @transform_0, window_bounds = array<i64: 16, 32>}, {transform_indices = @transform_1, window_bounds = array<i64: 32, 96>}, {transform_indices = @transform_2, window_bounds = array<i64: 16, 96>}]} {
    %c0_i32 = arith.constant 0 : i32
    %0 = arith.cmpi eq, %arg2, %c0_i32 : i32
    %1 = arith.extui %0 : i1 to i32
    %c0_i32_0 = arith.constant 0 : i32
    %2 = arith.cmpi ne, %1, %c0_i32_0 : i32
    scf.if %2 {
      %cst_10 = arith.constant 0.000000e+00 : f32
      %12 = vector.broadcast %cst_10 : f32 to vector<16x96xf32>
      %c0_11 = arith.constant 0 : index
      %c0_12 = arith.constant 0 : index
      %13 = vector.load %arg6[%c0_11, %c0_12] : memref<16x96xf32, #tpu.memory_space<vmem>>, vector<16x96xf32>
      tpu.vector_store %arg6[%c0_11, %c0_12], %12 {strides = array<i32>} : memref<16x96xf32, #tpu.memory_space<vmem>>, vector<16x96xf32>,
    } else {
    }
    %c0 = arith.constant 0 : index
    %c0_1 = arith.constant 0 : index
    %3 = vector.load %arg6[%c0, %c0_1] : memref<16x96xf32, #tpu.memory_space<vmem>>, vector<16x96xf32>
    %c0_2 = arith.constant 0 : index
    %c0_3 = arith.constant 0 : index
    %4 = vector.load %arg3[%c0_2, %c0_3] : memref<16x32xf32, #tpu.memory_space<vmem>>, vector<16x32xf32>
    %c0_4 = arith.constant 0 : index
    %c0_5 = arith.constant 0 : index
    %5 = vector.load %arg4[%c0_4, %c0_5] : memref<32x96xf32, #tpu.memory_space<vmem>>, vector<32x96xf32>
    %cst = arith.constant dense<0.000000e+00> : vector<16x96xf32>
    %6 = tpu.matmul %4, %5, %cst {dimension_numbers = #tpu.dot_dimension_numbers<[1], [0], [0], [1], [0, 0, 1, 1], [], []>} : vector<16x32xf32>, vector<32x96xf32>, vector<16x96xf32> -> vector<16x96xf32>
    %7 = arith.addf %3, %6 : vector<16x96xf32>
    %c0_6 = arith.constant 0 : index
    %c0_7 = arith.constant 0 : index
    %8 = vector.load %arg6[%c0_6, %c0_7] : memref<16x96xf32, #tpu.memory_space<vmem>>, vector<16x96xf32>
    tpu.vector_store %arg6[%c0_6, %c0_7], %7 {strides = array<i32>} : memref<16x96xf32, #tpu.memory_space<vmem>>, vector<16x96xf32>,
    %c0_i32_8 = arith.constant 0 : i32
    %9 = arith.cmpi eq, %arg2, %c0_i32_8 : i32
    %10 = arith.extui %9 : i1 to i32
    %c0_i32_9 = arith.constant 0 : i32
    %11 = arith.cmpi ne, %10, %c0_i32_9 : i32
    scf.if %11 {
      %c0_10 = arith.constant 0 : index
      %c0_11 = arith.constant 0 : index
      %12 = vector.load %arg6[%c0_10, %c0_11] : memref<16x96xf32, #tpu.memory_space<vmem>>, vector<16x96xf32>
      %c0_12 = arith.constant 0 : index
      %c0_13 = arith.constant 0 : index
      %13 = vector.load %arg5[%c0_12, %c0_13] : memref<16x96xf32, #tpu.memory_space<vmem>>, vector<16x96xf32>
      tpu.vector_store %arg5[%c0_12, %c0_13], %12 {strides = array<i32>} : memref<16x96xf32, #tpu.memory_space<vmem>>, vector<16x96xf32>,
    } else {
    }
    return
  }
  func.func @transform_0(%arg0: i32, %arg1: i32, %arg2: i32) -> (i32, i32) {
    %c0_i32 = arith.constant 0 : i32
    return %arg0, %arg2 : i32, i32
  }
  func.func @transform_1(%arg0: i32, %arg1: i32, %arg2: i32) -> (i32, i32) {
    %c0_i32 = arith.constant 0 : i32
    return %arg2, %arg1 : i32, i32
  }
  func.func @transform_2(%arg0: i32, %arg1: i32, %arg2: i32) -> (i32, i32) {
    %c0_i32 = arith.constant 0 : i32
    return %arg0, %arg1 : i32, i32
  }
}

</mosaic_0001>

<bundles_post_ra>
// kernel: tpu_custom_call.1
= control target key start
LH: loop header
LB: loop body
LE: loop exit
PB: predicated region body
PF: predicated region fallthrough
CT: control target
= control target key end

     0   :  { %7 = vsyncpa [#allocation4], 0  ;;  %s256_s0 = inlined_call_operand.hbm [shape: f32[16,32], index: 0, kind: input, shape index: {}]   ;;  %s257_s1 = inlined_call_operand.hbm [shape: f32[32,96], index: 1, kind: input, shape index: {}]   ;;  %s258_s2 = inlined_call_operand.hbm [shape: f32[16,96], index: 2, kind: output, shape index: {}]  }
   0x1   :  { %8 = vsyncpa [#allocation7], 0 }
   0x2   :  { %9 = vsyncpa [#allocation5], 0  ;;  %s14_s11 = sshll.u32 %s256_s0, 4  ;;  %s211_s12 = smov [#allocation3]   ;;  %s15_s11 = int_to_ptr.hbm [resolvable:$true] %s14_s11 }
   0x3   :  { %s16_s13 = sshll.u32 %s211_s12, 4  ;;  %s27_s16 = sshll.u32 %s257_s1, 4  ;;  %s17_s13 = int_to_ptr.vmem [resolvable:$true] %s16_s13  ;;  %s28_s16 = int_to_ptr.hbm [resolvable:$true] %s27_s16 }
   0x4   :  { %s212_s17 = smov 128   ;;  %s213_s18 = smov 8  }
   0x5   :  { %22 = dma.hbm_to_vmem [thread:$0]  %s15_s11, 256, %s17_s13, [#allocation4], %s212_s17, %s212_s17, %s213_s18  }
   0x6   :  { %s214_s19 = smov [#allocation6]  }
   0x7   :  { %s29_s20 = sshll.u32 %s214_s19, 4  ;;  %s30_s20 = int_to_ptr.vmem [resolvable:$true] %s29_s20 }
   0x8   :  { %35 = dma.hbm_to_vmem [thread:$0]  %s28_s16, 512, %s30_s20, [#allocation7], %s212_s17, %s212_s17, %s213_s18  }
   0x9   :  { %205 = dma.done.wait [#allocation4], 256  }
   0xa   :  { %206 = vsyncadd [#allocation4], 4294967040 }
   0xb   :  { %207 = dma.done.wait [#allocation7], 512  }
   0xc   :  { %208 = vsyncadd [#allocation7], 4294966784  ;;  %vm48_vm0 = vcmask 785408   ;;  %v215_v0 = vmov 0.0   ;;  %v58_v1 = vld [vmem:[#allocation6 + $0x18] sm:$0xff]  ;;  %v57_v2 = vld [vmem:[#allocation6 + $0x10] sm:$0xff] }
   0xd   :  { %49 = vst.msk [vmem:[#allocation2] sm:$0xff] %vm48_vm0, %v215_v0  ;;  %78 = vmatpush.msra.mxu0 %v58_v1  ;;  %123 = vmatpush.msra.mxu1 %v58_v1  ;;  %v56_v3 = vld [vmem:[#allocation6 + $0x8] sm:$0xff]  ;;  %v55_v4 = vld [vmem:[#allocation6] sm:$0xff]  ;;  %v53_v5 = vld [vmem:[#allocation3] sm:$0xff]  ;;  %vm59_vm1 = vcmask 261120   ;;  %s216_s0 = smov [#allocation8]  }
   0xe   :  { %50 = vst.msk [vmem:[#allocation2 + $0x8] sm:$0xff] %vm48_vm0, %v215_v0  ;;  %v54_v6 = vld [vmem:[#allocation3 + $0x8] sm:$0xff]  ;;  %s105_s1 = sshll.u32 %s216_s0, 4  ;;  %s107_s23 = sshll.u32 %s258_s2, 4  ;;  %s106_s1 = int_to_ptr.vmem [resolvable:$true] %s105_s1  ;;  %s108_s23 = int_to_ptr.hbm [resolvable:$true] %s107_s23 }
   0xf   :  { %79 = vmatpush.msra.mxu0 %v57_v2  ;;  %124 = vmatpush.msra.mxu1 %v57_v2 }
  0x11   :  { %80 = vmatpush.msra.mxu0 %v56_v3  ;;  %125 = vmatpush.msra.mxu1 %v56_v3 }
  0x13   :  { %81 = vmatpush.msra.mxu0 %v55_v4  ;;  %126 = vmatpush.msra.mxu1 %v55_v4 }
  0x14   :  { %121 = vmatmul.msk.f32.vlgmr.msra.gmra.mxu0 %vm59_vm1, %v53_v5  ;;  %122 = vmatmul.msk.f32.vlgmr.msra.gmra.mxu1 %vm59_vm1, %v54_v6  ;;  %v51_v7 = vld [vmem:[#allocation2] sm:$0xff] }
  0x15   :  { %v52_v8 = vld [vmem:[#allocation2 + $0x8] sm:$0xff] }
  0x91   :  { %v83_v9 = vpop.f32.mrf.mxu0  ;;  %v86_v10 = vpop.f32.mrf.mxu1 }
  0x92   :  { %v89_v11 = vadd.f32 %v83_v9, %v51_v7  ;;  %v90_v12 = vadd.f32 %v86_v10, %v52_v8 }
  0x94   :  { %92 = vst.msk [vmem:[#allocation2] sm:$0xff] %vm48_vm0, %v89_v11 }
  0x95   :  { %93 = vst.msk [vmem:[#allocation2 + $0x8] sm:$0xff] %vm48_vm0, %v90_v12 }
  0x9b   :  { %v97_v13 = vld [vmem:[#allocation2] sm:$0xff] }
  0x9c   :  { %v98_v14 = vld [vmem:[#allocation2 + $0x8] sm:$0xff]  ;;  %99 = vst.msk [vmem:[#allocation8] sm:$0xff] %vm48_vm0, %v97_v13 }
  0x9d   :  { %100 = vst.msk [vmem:[#allocation8 + $0x8] sm:$0xff] %vm48_vm0, %v98_v14 }
  0x9e   :  { %113 = dma.vmem_to_hbm [thread:$0]  %s106_s1, 256, %s108_s23, [#allocation5], %s212_s17, %s212_s17, %s213_s18  }
  0x9f   :  { %209 = dma.done.wait [#allocation5], 256  }
  0xa0   :  { %210 = vsyncadd [#allocation5], 4294967040 }
  0xa1   :  { %118 = vsyncpa [#allocation4], 1 }
  0xa2   :  { %119 = vsyncpa [#allocation7], 1 }
  0xa3   :  { %120 = vsyncpa [#allocation5], 1 }

</bundles_post_ra>
